<compile_context>
chip_gen: v6e
topology: v6e:2x2x1
jax: 0.10.0
libtpu: 0.0.40
codegen_flags: <defaults>
</compile_context>

<pallas_src>
import jax
import jax.numpy as jnp
from jax.experimental import pallas as pl
from jax.experimental.pallas import tpu as pltpu


def _round_up(x, m):
    return (x + m - 1) // m * m


def _outconv_kernel(x_ref, w_ref, b_ref, o_ref):
    # x_ref: (1, C_in, TL)  w_ref: (C_out_p, C_in)  b_ref: (C_out_p, 1)
    x = x_ref[0]                                              # (C_in, TL)
    w = w_ref[...]                                            # (C_out_p, C_in)
    y = jnp.dot(w, x, preferred_element_type=jnp.float32)     # MXU, f32 acc
    y = y + b_ref[...]                                        # f32 bias (VPU)
    o_ref[0] = y.astype(o_ref.dtype)


def _outconv_pallas(x, weight, bias, *, tile_l, vmem_limit_bytes):
    B, C_in, L = x.shape
    C_out = weight.shape[0]
    out_dtype = x.dtype

    # Pad C_out to a sublane multiple (8) -> full-sublane output stores.
    C_out_p = _round_up(max(C_out, 1), 8)
    w_p = jnp.zeros((C_out_p, C_in), dtype=weight.dtype).at[:C_out].set(weight)
    b_p = jnp.zeros((C_out_p, 1), dtype=jnp.float32).at[:C_out, 0].set(
        bias.astype(jnp.float32))

    # Length tile: multiple of 128, capped at tile_l; pad L up to a multiple.
    TL = min(_round_up(tile_l, 128), _round_up(L, 128))
    L_pad = _round_up(L, TL)
    if L_pad != L:
        x = jnp.pad(x, ((0, 0), (0, 0), (0, L_pad - L)))
    n_l = L_pad // TL

    itemsize = jnp.dtype(x.dtype).itemsize
    cost = pl.CostEstimate(
        flops=2 * B * C_out * C_in * L,
        transcendentals=0,
        bytes_accessed=(B * C_in * L_pad * itemsize            # x read (dominant)
                        + B * C_out_p * L_pad * jnp.dtype(out_dtype).itemsize
                        + w_p.size * jnp.dtype(w_p.dtype).itemsize
                        + b_p.size * 4))

    out = pl.pallas_call(
        _outconv_kernel,
        out_shape=jax.ShapeDtypeStruct((B, C_out_p, L_pad), out_dtype),
        grid_spec=pltpu.PrefetchScalarGridSpec(
            num_scalar_prefetch=0,
            grid=(B, n_l),
            in_specs=[
                pl.BlockSpec((1, C_in, TL), lambda b, l: (b, 0, l)),
                pl.BlockSpec((C_out_p, C_in), lambda b, l: (0, 0)),
                pl.BlockSpec((C_out_p, 1), lambda b, l: (0, 0)),
            ],
            out_specs=pl.BlockSpec((1, C_out_p, TL), lambda b, l: (b, 0, l)),
        ),
        compiler_params=pltpu.CompilerParams(
            dimension_semantics=("parallel", "parallel"),
            vmem_limit_bytes=vmem_limit_bytes,
        ),
        cost_estimate=cost,
    )(x, w_p, b_p)

    # Drop C_out / L padding.
    return out[:, :C_out, :L]


def outconv(x, weight, bias, *, tile_l=1024, compute_dtype=None,
            vmem_limit_bytes=32 * 1024 * 1024, force_pallas=False):
    """1x1 Conv1d: x (B, C_in, L), weight (C_out, C_in), bias (C_out,).

    compute_dtype: optionally cast x/weight (e.g. jnp.bfloat16) to halve HBM
    traffic on the mem-bound path; accumulation and bias stay in f32.
    """
    B, C_in, L = x.shape
    out_dtype = x.dtype

    if compute_dtype is not None:
        x = x.astype(compute_dtype)
        weight = weight.astype(compute_dtype)

    # Tiny problems: Pallas launch / per-step overhead dominates -> plain XLA.
    if not force_pallas and (B * C_in * L) < (1 << 16):
        y = jnp.einsum("oc,bcl->bol", weight, x,
                       preferred_element_type=jnp.float32)
        return (y + bias.astype(jnp.float32)[None, :, None]).astype(out_dtype)

    return _outconv_pallas(
        x, weight, bias, tile_l=tile_l,
        vmem_limit_bytes=vmem_limit_bytes).astype(out_dtype)


if __name__ == "__main__":
    # Module config: OutConv(in_channels=4, out_channels=3)
    B, C_in, C_out, L = 2, 4, 3, 16

    key = jax.random.PRNGKey(0)
    kx, kw, kb = jax.random.split(key, 3)

    x = jax.random.normal(kx, (B, C_in, L), dtype=jnp.float32)

    # Deterministic init mimicking nn.Conv1d default (U(+-1/sqrt(fan_in))).
    bound = 1.0 / jnp.sqrt(jnp.float32(C_in))
    weight = jax.random.uniform(kw, (C_out, C_in), jnp.float32, -bound, bound)
    bias = jax.random.uniform(kb, (C_out,), jnp.float32, -bound, bound)

    # Force the Pallas path so the kernel itself is exercised at test size.
    out = outconv(x, weight, bias, force_pallas=True)
    out = jax.block_until_ready(out)

    # Pure-JAX reference (1x1 conv == channel matmul + bias).
    ref = jnp.einsum("oc,bcl->bol", weight, x) + bias[None, :, None]
    assert out.shape == (B, C_out, L)
    assert jnp.allclose(out, ref, atol=1e-5, rtol=1e-5)

    # Also check the tiny-problem (non-Pallas) dispatch path matches.
    out_small = jax.block_until_ready(outconv(x, weight, bias))
    assert jnp.allclose(out_small, ref, atol=1e-5, rtol=1e-5)

    print("KERNEL_OK")
</pallas_src>

<mosaic_0001>
module attributes {stable_mosaic.version = 11 : i64} {
  func.func @_outconv_kernel(%arg0: i32, %arg1: i32, %arg2: memref<1x4x128xf32, #tpu.memory_space<vmem>>, %arg3: memref<8x4xf32, #tpu.memory_space<vmem>>, %arg4: memref<8x1xf32, #tpu.memory_space<vmem>>, %arg5: memref<1x8x128xf32, #tpu.memory_space<vmem>>) attributes {dimension_semantics = [#tpu.dimension_semantics<parallel>, #tpu.dimension_semantics<parallel>], iteration_bounds = array<i64: 2, 1>, scalar_prefetch = 0 : i64, scratch_operands = 0 : i64, tpu.core_type = #tpu.core_type<tc>, window_params = [{transform_indices = @transform_0, window_bounds = array<i64: 1, 4, 128>}, {pipeline_mode = #tpu.pipeline_mode<synchronous>, transform_indices = @transform_1, window_bounds = array<i64: 8, 4>}, {pipeline_mode = #tpu.pipeline_mode<synchronous>, transform_indices = @transform_2, window_bounds = array<i64: 8, 1>}, {transform_indices = @transform_3, window_bounds = array<i64: 1, 8, 128>}]} {
    %c0 = arith.constant 0 : index
    %c0_0 = arith.constant 0 : index
    %c0_1 = arith.constant 0 : index
    %0 = vector.load %arg2[%c0, %c0_0, %c0_1] : memref<1x4x128xf32, #tpu.memory_space<vmem>>, vector<1x4x128xf32>
    %1 = vector.shape_cast %0 : vector<1x4x128xf32> to vector<4x128xf32>
    %c0_2 = arith.constant 0 : index
    %c0_3 = arith.constant 0 : index
    %2 = vector.load %arg3[%c0_2, %c0_3] : memref<8x4xf32, #tpu.memory_space<vmem>>, vector<8x4xf32>
    %cst = arith.constant dense<0.000000e+00> : vector<8x128xf32>
    %3 = tpu.matmul %2, %1, %cst {dimension_numbers = #tpu.dot_dimension_numbers<[1], [0], [0], [1], [0, 0, 1, 1], [], []>} : vector<8x4xf32>, vector<4x128xf32>, vector<8x128xf32> -> vector<8x128xf32>
    %c0_4 = arith.constant 0 : index
    %c0_5 = arith.constant 0 : index
    %4 = vector.load %arg4[%c0_4, %c0_5] : memref<8x1xf32, #tpu.memory_space<vmem>>, vector<8x1xf32>
    %5 = vector.broadcast %4 : vector<8x1xf32> to vector<8x128xf32>
    %6 = arith.addf %3, %5 : vector<8x128xf32>
    %c0_6 = arith.constant 0 : index
    %c0_7 = arith.constant 0 : index
    %c0_8 = arith.constant 0 : index
    %7 = vector.load %arg5[%c0_6, %c0_7, %c0_8] : memref<1x8x128xf32, #tpu.memory_space<vmem>>, vector<1x8x128xf32>
    %8 = vector.shape_cast %7 : vector<1x8x128xf32> to vector<8x128xf32>
    %9 = vector.shape_cast %6 : vector<8x128xf32> to vector<1x8x128xf32>
    tpu.vector_store %arg5[%c0_6, %c0_7, %c0_8], %9 {strides = array<i32>} : memref<1x8x128xf32, #tpu.memory_space<vmem>>, vector<1x8x128xf32>,
    return
  }
  func.func @transform_0(%arg0: i32, %arg1: i32) -> (i32, i32, i32) {
    %c0_i32 = arith.constant 0 : i32
    %c0_i32_0 = arith.constant 0 : i32
    return %arg0, %c0_i32, %arg1 : i32, i32, i32
  }
  func.func @transform_1(%arg0: i32, %arg1: i32) -> (i32, i32) {
    %c0_i32 = arith.constant 0 : i32
    %c0_i32_0 = arith.constant 0 : i32
    %c0_i32_1 = arith.constant 0 : i32
    return %c0_i32, %c0_i32_0 : i32, i32
  }
  func.func @transform_2(%arg0: i32, %arg1: i32) -> (i32, i32) {
    %c0_i32 = arith.constant 0 : i32
    %c0_i32_0 = arith.constant 0 : i32
    %c0_i32_1 = arith.constant 0 : i32
    return %c0_i32, %c0_i32_0 : i32, i32
  }
  func.func @transform_3(%arg0: i32, %arg1: i32) -> (i32, i32, i32) {
    %c0_i32 = arith.constant 0 : i32
    %c0_i32_0 = arith.constant 0 : i32
    return %arg0, %c0_i32, %arg1 : i32, i32, i32
  }
}

</mosaic_0001>

<bundles_post_ra>
// kernel: tpu_custom_call.1
= control target key start
LH: loop header
LB: loop body
LE: loop exit
PB: predicated region body
PF: predicated region fallthrough
CT: control target
= control target key end

     0   :  { %8 = vsyncpa [#allocation3], 0  ;;  %s656_s0 = inlined_call_operand.vmem [shape: f32[2,4,128], index: 0, kind: input, shape index: {}]   ;;  %s657_s1 = inlined_call_operand.vmem [shape: f32[8,4], index: 1, kind: input, shape index: {}]   ;;  %s658_s2 = inlined_call_operand.vmem [shape: f32[8,1], index: 2, kind: input, shape index: {}]   ;;  %s659_s3 = inlined_call_operand.hbm [shape: f32[2,8,128], index: 3, kind: output, shape index: {}]  }
   0x1   :  { %10 = vsyncpa [#allocation3 + $0x1], 0  ;;  %s545_s12 = smov 0   ;;  %s547_s13 = smov 0  }
   0x2   :  { %s549_s14 = smov 0   ;;  %s551_s15 = smov 0  }
   0x3   :  { %s553_s16 = smov 0   ;;  %s555_s17 = smov 0  }
   0x4 LB: > { %s364_s18 = sadd.s32 4294967295, %s519_s17   ;;  %s365_s19 = sadd.s32 4294967294, %s519_s17   ;;  %s519_s17 = sphi %s555_s17, %s16_s17   ;;  %s515_s16 = sphi %s553_s16, %s666_s16   ;;  %s511_s15 = sphi %s551_s15, %s665_s15   ;;  %s507_s14 = sphi %s549_s14, %s664_s14   ;;  %s503_s13 = sphi %s547_s13, %s663_s13   ;;  %s499_s12 = sphi %s545_s12, %s662_s12  }
   0x5   : > { %s28_s20 = sadd.s32 1, %s515_s16  ;;  %s107_s21 = sadd.s32 1, %s507_s14 }
   0x6   : > { %p30_p0 = scmp.ge.s32.totalorder %s28_s20, 2  ;;  %p117_p1 = scmp.ne.s32.totalorder %s507_s14, %s503_s13 }
   0x7   : > { %p118_p2 = scmp.eq.s32.totalorder %s364_s18, 1  ;;  %p123_p3 = scmp.ne.s32.totalorder %s503_s13, %s499_s12 }
   0x8   : > { %s668_s20 = smov (%p30_p0, %s28_s20), 0  ;;  %p124_p5 = scmp.eq.s32.totalorder %s365_s19, 1 }
   0x9   : > { %p585_p4 = por %p118_p2, %p117_p1  ;;  %s102_s23 = ssub.s32 %s515_s16, %s668_s20 }
   0xa   : > { %p368_p6 = scmp.ge.s32.totalorder %s519_s17, 1  ;;  %p105_p7 = scmp.eq.s32.totalorder %s102_s23, 0 }
   0xb   : > { %p592_p8 = por %p124_p5, %p123_p3  ;;  %p158_p9 = scmp.lt.s32.totalorder %s519_s17, 3 }
   0xc   : > { %s598_s25 = scalar_select %p105_p7, %s507_s14, %s107_s21  }
   0xd   : > { %p159_p10 = pnand %p368_p6, %p158_p9 }
   0xe   : > { %p184_p11 = scmp.lt.s32.totalorder (!%p159_p10), %s511_s15, 1  ;;  %s181_s8 = sand.u32 (!%p159_p10), 1, %s503_s13  }
   0xf   : > { %162 = sbr.rel (%p159_p10) target bundleno = 234 (0xea), region = 32  ;;  %s369_s9 = sshll.u32 (!%p159_p10), %s181_s8, 3 }
  0x10   : > { %s374_s10 = sshll.u32 (!%p159_p10), %s511_s15, 7  ;;  %s183_s11 = scalar_lea.vmem (!%p159_p10), [#allocation2], %s369_s9 }
  0x11   : > { %s293_s18 = sshll.u32 (!%p159_p10), %s183_s11, 4  ;;  %s616_s23 = scalar_lea.hbm (!%p159_p10), %s659_s3, %s374_s10  ;;  %s294_s18 = int_to_ptr.vmem [resolvable:$true] %s293_s18 }
  0x12   : > { %s279_s26 = scalar_lea.sflag (!%p159_p10), [#allocation3], %s181_s8  ;;  %s443_s27 = scalar_lea.vmem (!%p159_p10), %s294_s18, 128 }
  0x13   : > { %p444_p12 = scmp.ne.s32.totalorder (!%p159_p10), %s294_s18, %s443_s27 }
  0x14   : > { %v521_v0 = vmov 0.0   ;;  %vm522_vm0 = vmmov 0   ;;  %v193_v1 = vld [vmem:[%s658_s2] sm:$0xff]  ;;  %s185_s28 = scalar_select %p184_p11, %s511_s15, 1  ;;  %v523_v2 = vmov 0   ;;  %vm203_vm1 = vcmask 1043456  }
  0x15   : > { %379 = vmatprep.subr.mxu0 %v521_v0  ;;  %381 = vmatprep.mubr.msk.f32.mxu0 %vm522_vm0, %v521_v0  ;;  %v192_v3 = vld [vmem:[%s657_s1] sm:$0xff]  ;;  %vm199_vm2 = vcmask 31744   ;;  %p445_p13 = pnand %p444_p12, %p585_p4 }
  0x16   : > { %442 = vset.pattern.permute.xlu0 %v523_v2  ;;  %s370_s29 = sshll.u32 %s185_s28, 2  ;;  %s524_s28 = smov [#allocation2]  }
  0x17   : > { %196 = vperm.xlu0 %442, %v193_v1   ;;  %s190_s5 = scalar_lea.vmem %s656_s0, %s370_s29  ;;  %p446_p0 = pneg %p445_p13 }
  0x18   : > { %v191_v4 = vld [vmem:[%s190_s5] sm:$0xf]  ;;  %s447_s15 = sshll.u32 %s524_s28, 4  ;;  %s448_s15 = int_to_ptr.vmem [resolvable:$false] %s447_s15 }
  0x19   : > { %380 = vmatpush3.msk.msra.mxu0 %vm203_vm1, %v191_v4  ;;  %s449_s29 = scalar_lea.vmem %s448_s15, 256  ;;  %p450_p1 = scmp.lt.s32.totalorder %s294_s18, %s448_s15 }
  0x1a   : > { %382 = vmatmul.mubr.msk.f32.vlgmr.msra.gmra.mxu0 %vm199_vm2, %v192_v3  ;;  %p451_p2 = scmp.lt.s32.totalorder %s449_s29, %s443_s27 }
  0x1c   : > { %p452_p3 = por %p451_p2, %p450_p1 }
  0x1e   : > { %p453_p5 = pnand %p452_p3, %p446_p0 }
  0x92   : > { %v197_v5 = vpop.permute.xlu0 %196 }
  0xda   : > { %v273_v6 = vpop.f32.mrf.mxu0 }
  0xdb   : > { %v274_v7 = vadd.f32 %v273_v6, %v197_v5 }
  0xdc   : > { %v383_v8 = vpop.f32.mrf.mxu0 }
  0xdd   : > { %277 = vst [vmem:[%s183_s11] sm:$0xff] %v274_v7 }
  0xde   : > { %456 = shalt.err (!%p453_p5)
}
  0xdf   : > { %s457_s30 = scalar_lea.hbm %s616_s23, 128  ;;  %s461_s6 = scalar_lea.hbm %s659_s3, 256 }
  0xe0   : > { %p458_p6 = scmp.ne.s32.totalorder %s616_s23, %s457_s30  ;;  %p462_p10 = scmp.lt.s32.totalorder %s616_s23, %s659_s3 }
  0xe1   : > { %p463_p11 = scmp.lt.s32.totalorder %s461_s6, %s457_s30 }
  0xe2   : > { %p459_p7 = pnand %p458_p6, %p585_p4 }
  0xe3   : > { %p464_p12 = por %p463_p11, %p462_p10 }
  0xe4   : > { %p460_p9 = pneg %p459_p7 }
  0xe6   : > { %p465_p13 = pnand %p464_p12, %p460_p9 }
  0xe8   : > { %468 = shalt.err (!%p465_p13)
}
  0xe9   : > { %384 = dma.vmem_to_hbm [thread:$0]  (%p585_p4), %s294_s18, 128, %s616_s23, %s279_s26  }
  0xea PF: > { %p390_p0 = scmp.ge.s32.totalorder %s519_s17, 2  ;;  %s305_s9 = sand.u32 1, %s499_s12  }
  0xeb   : > { %s306_s10 = scalar_lea.sflag [#allocation3], %s305_s9 }
  0xec   : > { %p387_p1 = pnand %p390_p0, %p592_p8 }
  0xee   : > { %p388_p2 = pneg %p387_p1 }
  0xf0   : > { %494 = dma.done.wait (%p388_p2), %s306_s10, 128  }
  0xf1   : > { %496 = vsyncadd (%p388_p2), %s306_s10, 4294967168  ;;  %s16_s17 = sadd.s32 1, %s519_s17   ;;  %s662_s12 = smov %s503_s13 }
  0xf2   : > { %p13_p3 = scmp.ge.s32.totalorder %s16_s17, 4   ;;  %s663_s13 = smov %s507_s14 }
  0xf3   : > { %s664_s14 = smov %s598_s25  ;;  %s665_s15 = smov %s515_s16 }
  0xf4   : > { %s666_s16 = smov %s668_s20  ;;  %15 = sbr.rel (!%p13_p3) target bundleno = 4 (0x4), region = 67 }
  0xf9   :  { %311 = vsyncpa [#allocation3], 1 }
  0xfa   :  { %313 = vsyncpa [#allocation3 + $0x1], 1 }

</bundles_post_ra>
